<compile_context>
chip_gen: v5e
topology: v5e:2x2
jax: 0.10.0
libtpu: 0.0.40
codegen_flags: <defaults>
</compile_context>

<pallas_src>
import functools

import jax
import jax.numpy as jnp
from jax.experimental import pallas as pl
from jax.experimental.pallas import tpu as pltpu


def _ml_ce_kernel(logits_ref, labels_ref, out_ref, *,
                  levels, level_weights, batch_size, tile_b):
    """Per-batch-tile partial sum of the weighted multi-level CE loss.

    logits_ref : (TB, C_total) float   (VMEM tile)
    labels_ref : (TB, num_levels) int32 (VMEM tile)
    out_ref    : (1, 8, 128) float32    (VMEM) -- tile partial sum at [0, 0, 0]
    """
    tile_idx = pl.program_id(0)
    tb = logits_ref.shape[0]
    labels = labels_ref[...]                                   # (TB, L) int32

    loss = jnp.zeros((tb, 1), jnp.float32)
    start = 0
    # `levels` is static -> Python loop unrolls at trace time; all slices static.
    for level_id, level_len in enumerate(levels):
        # Slice this level's logits directly from the ref (avoid materializing the
        # whole tile in f32; works for bf16 or f32 inputs).
        lg = logits_ref[:, start:start + level_len].astype(jnp.float32)  # (TB, Cl)
        # Numerically stable log-sum-exp.
        m = jnp.max(lg, axis=-1, keepdims=True)                          # (TB, 1)
        lse = m + jnp.log(jnp.sum(jnp.exp(lg - m), axis=-1, keepdims=True))
        lab = labels[:, level_id:level_id + 1]                           # (TB, 1)
        cls_iota = jax.lax.broadcasted_iota(jnp.int32, lg.shape, 1)
        label_logit = jnp.sum(
            jnp.where(cls_iota == lab, lg, 0.0), axis=-1, keepdims=True)  # (TB, 1)
        ce = lse - label_logit                                            # per-sample CE
        loss = loss + jnp.float32(level_weights[level_id]) * ce
        start += level_len

    # Mask rows that are batch padding (B was padded up to a multiple of TB).
    row = tile_idx * tile_b + jax.lax.broadcasted_iota(jnp.int32, (tb, 1), 0)
    loss = jnp.where(row < batch_size, loss, 0.0)
    partial = jnp.sum(loss)

    # Write the tile's partial sum into element [0, 0, 0] of a lane/sublane-aligned
    # (1, 8, 128) output block; everything else is zero so a plain jnp.sum outside
    # recovers the total.
    sub = jax.lax.broadcasted_iota(jnp.int32, (1, 8, 128), 1)
    lane = jax.lax.broadcasted_iota(jnp.int32, (1, 8, 128), 2)
    out_ref[...] = jnp.where((sub == 0) & (lane == 0), partial, 0.0)


def multi_level_ce_loss(outputs, labels, level_labels, *,
                        levels, level_weights=None, tile_b=None):
    """Pallas wrapper. `labels` is accepted (as in the torch forward) but unused."""
    del labels  # unused by the reference forward as well
    levels = tuple(int(l) for l in levels)
    if level_weights is None:
        level_weights = [1.0] * len(levels)
    level_weights = tuple(float(w) for w in level_weights)

    B, c_total = outputs.shape
    num_levels = len(levels)
    assert c_total == sum(levels), "outputs class dim must equal sum(levels)"
    level_labels = level_labels.astype(jnp.int32)

    itemsize = jnp.dtype(outputs.dtype).itemsize
    if tile_b is None:
        # Budget ~16 MiB for the double-buffered input tiles (2 buffers x both
        # inputs) so the kernel stays well under the scoped VMEM limit on every
        # generation (v5e default 16 MiB, v7x physical 64 MiB).
        bytes_per_row = c_total * itemsize + num_levels * 4
        budget = 16 * 1024 * 1024
        tile_b = (budget // (2 * bytes_per_row)) // 8 * 8
        tile_b = max(8, min(1024, tile_b))
    b_ceil = ((B + 7) // 8) * 8
    tile_b = min(tile_b, b_ceil)
    tile_b = max(8, (tile_b // 8) * 8)

    num_tiles = pl.cdiv(B, tile_b)
    b_pad = num_tiles * tile_b
    if b_pad != B:
        # Pad with zeros (class 0 labels) -> finite CE values that the kernel masks.
        outputs = jnp.pad(outputs, ((0, b_pad - B), (0, 0)))
        level_labels = jnp.pad(level_labels, ((0, b_pad - B), (0, 0)))

    kernel = functools.partial(
        _ml_ce_kernel, levels=levels, level_weights=level_weights,
        batch_size=B, tile_b=tile_b)

    cost = pl.CostEstimate(
        flops=int(6 * b_pad * c_total),
        transcendentals=int(b_pad * c_total),
        bytes_accessed=int(b_pad * c_total * itemsize
                           + b_pad * num_levels * 4
                           + num_tiles * 8 * 128 * 4),
    )

    partials = pl.pallas_call(
        kernel,
        out_shape=jax.ShapeDtypeStruct((num_tiles, 8, 128), jnp.float32),
        grid=(num_tiles,),
        in_specs=[
            pl.BlockSpec((tile_b, c_total), lambda i: (i, 0)),     # logits tile
            pl.BlockSpec((tile_b, num_levels), lambda i: (i, 0)),  # label tile
        ],
        out_specs=pl.BlockSpec((1, 8, 128), lambda i: (i, 0, 0)),
        compiler_params=pltpu.CompilerParams(
            dimension_semantics=("parallel",),        # shard tiles across TCs on v7x
            vmem_limit_bytes=32 * 1024 * 1024,        # explicit; > v5e's 16 MiB default
        ),
        cost_estimate=cost,
    )(outputs, level_labels)

    # Tiny finalization in JAX: sum of per-tile partials, mean over the real batch.
    return jnp.sum(partials) / jnp.float32(B)


def _reference_loss(outputs, level_labels, levels, level_weights):
    """Pure-JAX reference mirroring the PyTorch forward."""
    loss = jnp.zeros((outputs.shape[0],), jnp.float32)
    start = 0
    for level_id, level_len in enumerate(levels):
        lg = outputs[:, start:start + level_len].astype(jnp.float32)
        logp = jax.nn.log_softmax(lg, axis=-1)
        lab = level_labels[:, level_id]
        ce = -jnp.take_along_axis(logp, lab[:, None], axis=-1)[:, 0]
        loss = loss + level_weights[level_id] * ce
        start += level_len
    return jnp.mean(loss)


if __name__ == "__main__":
    # Synthetic label hierarchy: 3 levels with 3, 5 and 8 classes -> 16 total logits.
    levels = (3, 5, 8)
    level_weights = (1.0, 0.5, 0.25)
    batch = 20          # deliberately NOT a multiple of the tile -> exercises padding/mask
    c_total = sum(levels)

    key = jax.random.PRNGKey(0)
    k_out, k_lab = jax.random.split(key)
    outputs = jax.random.normal(k_out, (batch, c_total), dtype=jnp.float32)
    # One integer label per level, each within that level's class count.
    level_labels = jnp.stack(
        [jax.random.randint(jax.random.fold_in(k_lab, i), (batch,), 0, n)
         for i, n in enumerate(levels)],
        axis=1,
    ).astype(jnp.int32)
    labels = jnp.zeros((batch,), jnp.int32)  # unused, mirrors torch forward signature

    # tile_b=8 forces a multi-tile grid (3 tiles over a padded batch of 24).
    loss = multi_level_ce_loss(outputs, labels, level_labels,
                               levels=levels, level_weights=level_weights, tile_b=8)
    loss = jax.block_until_ready(loss)

    ref = _reference_loss(outputs, level_labels, levels, level_weights)
    assert jnp.allclose(loss, ref, atol=1e-5, rtol=1e-5), (loss, ref)
    print("KERNEL_OK")
</pallas_src>

<mosaic_0001>
module attributes {stable_mosaic.version = 11 : i64} {
  func.func @_ml_ce_kernel(%arg0: i32, %arg1: memref<8x16xf32, #tpu.memory_space<vmem>>, %arg2: memref<8x3xi32, #tpu.memory_space<vmem>>, %arg3: memref<1x8x128xf32, #tpu.memory_space<vmem>>) attributes {dimension_semantics = [#tpu.dimension_semantics<parallel>], iteration_bounds = array<i64: 3>, scalar_prefetch = 0 : i64, scratch_operands = 0 : i64, tpu.core_type = #tpu.core_type<tc>, window_params = [{transform_indices = @transform_0, window_bounds = array<i64: 8, 16>}, {transform_indices = @transform_1, window_bounds = array<i64: 8, 3>}, {transform_indices = @transform_2, window_bounds = array<i64: 1, 8, 128>}]} {
    %c0 = arith.constant 0 : index
    %c0_0 = arith.constant 0 : index
    %0 = vector.load %arg2[%c0, %c0_0] : memref<8x3xi32, #tpu.memory_space<vmem>>, vector<8x3xi32>
    %cst = arith.constant 0.000000e+00 : f32
    %1 = vector.broadcast %cst : f32 to vector<8x1xf32>
    %c0_1 = arith.constant 0 : index
    %c0_2 = arith.constant 0 : index
    %2 = vector.load %arg1[%c0_1, %c0_2] : memref<8x16xf32, #tpu.memory_space<vmem>>, vector<8x3xf32>
    %cst_3 = arith.constant dense<0xFF800000> : vector<8xf32>
    %3 = vector.multi_reduction <maximumf>, %2, %cst_3 [1] : vector<8x3xf32> to vector<8xf32>
    %4 = vector.shape_cast %3 : vector<8xf32> to vector<8x1xf32>
    %5 = vector.broadcast %4 : vector<8x1xf32> to vector<8x3xf32>
    %6 = arith.subf %2, %5 : vector<8x3xf32>
    %7 = math.exp %6 : vector<8x3xf32>
    %cst_4 = arith.constant dense<0.000000e+00> : vector<8xf32>
    %8 = vector.multi_reduction <add>, %7, %cst_4 [1] : vector<8x3xf32> to vector<8xf32>
    %9 = vector.shape_cast %8 : vector<8xf32> to vector<8x1xf32>
    %10 = math.log %9 : vector<8x1xf32>
    %11 = arith.addf %4, %10 : vector<8x1xf32>
    %12 = vector.extract_strided_slice %0 {offsets = [0, 0], sizes = [8, 1], strides = [1, 1]} : vector<8x3xi32> to vector<8x1xi32>
    %13 = tpu.iota {dimensions = array<i32: 1>} : vector<8x3xi32>
    %14 = vector.broadcast %12 : vector<8x1xi32> to vector<8x3xi32>
    %15 = arith.cmpi eq, %13, %14 : vector<8x3xi32>
    %cst_5 = arith.constant 0.000000e+00 : f32
    %16 = vector.broadcast %cst_5 : f32 to vector<8x3xf32>
    %17 = arith.select %15, %2, %16 : vector<8x3xi1>, vector<8x3xf32>
    %cst_6 = arith.constant dense<0.000000e+00> : vector<8xf32>
    %18 = vector.multi_reduction <add>, %17, %cst_6 [1] : vector<8x3xf32> to vector<8xf32>
    %19 = vector.shape_cast %18 : vector<8xf32> to vector<8x1xf32>
    %20 = arith.subf %11, %19 : vector<8x1xf32>
    %cst_7 = arith.constant 1.000000e+00 : f32
    %21 = vector.broadcast %cst_7 : f32 to vector<8x1xf32>
    %22 = arith.mulf %21, %20 : vector<8x1xf32>
    %23 = arith.addf %1, %22 : vector<8x1xf32>
    %c0_8 = arith.constant 0 : index
    %c3 = arith.constant 3 : index
    %24 = vector.load %arg1[%c0_8, %c3] : memref<8x16xf32, #tpu.memory_space<vmem>>, vector<8x5xf32>
    %cst_9 = arith.constant dense<0xFF800000> : vector<8xf32>
    %25 = vector.multi_reduction <maximumf>, %24, %cst_9 [1] : vector<8x5xf32> to vector<8xf32>
    %26 = vector.shape_cast %25 : vector<8xf32> to vector<8x1xf32>
    %27 = vector.broadcast %26 : vector<8x1xf32> to vector<8x5xf32>
    %28 = arith.subf %24, %27 : vector<8x5xf32>
    %29 = math.exp %28 : vector<8x5xf32>
    %cst_10 = arith.constant dense<0.000000e+00> : vector<8xf32>
    %30 = vector.multi_reduction <add>, %29, %cst_10 [1] : vector<8x5xf32> to vector<8xf32>
    %31 = vector.shape_cast %30 : vector<8xf32> to vector<8x1xf32>
    %32 = math.log %31 : vector<8x1xf32>
    %33 = arith.addf %26, %32 : vector<8x1xf32>
    %34 = vector.extract_strided_slice %0 {offsets = [0, 1], sizes = [8, 1], strides = [1, 1]} : vector<8x3xi32> to vector<8x1xi32>
    %35 = tpu.iota {dimensions = array<i32: 1>} : vector<8x5xi32>
    %36 = vector.broadcast %34 : vector<8x1xi32> to vector<8x5xi32>
    %37 = arith.cmpi eq, %35, %36 : vector<8x5xi32>
    %cst_11 = arith.constant 0.000000e+00 : f32
    %38 = vector.broadcast %cst_11 : f32 to vector<8x5xf32>
    %39 = arith.select %37, %24, %38 : vector<8x5xi1>, vector<8x5xf32>
    %cst_12 = arith.constant dense<0.000000e+00> : vector<8xf32>
    %40 = vector.multi_reduction <add>, %39, %cst_12 [1] : vector<8x5xf32> to vector<8xf32>
    %41 = vector.shape_cast %40 : vector<8xf32> to vector<8x1xf32>
    %42 = arith.subf %33, %41 : vector<8x1xf32>
    %cst_13 = arith.constant 5.000000e-01 : f32
    %43 = vector.broadcast %cst_13 : f32 to vector<8x1xf32>
    %44 = arith.mulf %43, %42 : vector<8x1xf32>
    %45 = arith.addf %23, %44 : vector<8x1xf32>
    %c0_14 = arith.constant 0 : index
    %c8 = arith.constant 8 : index
    %46 = vector.load %arg1[%c0_14, %c8] : memref<8x16xf32, #tpu.memory_space<vmem>>, vector<8x8xf32>
    %cst_15 = arith.constant dense<0xFF800000> : vector<8xf32>
    %47 = vector.multi_reduction <maximumf>, %46, %cst_15 [1] : vector<8x8xf32> to vector<8xf32>
    %48 = vector.shape_cast %47 : vector<8xf32> to vector<8x1xf32>
    %49 = vector.broadcast %48 : vector<8x1xf32> to vector<8x8xf32>
    %50 = arith.subf %46, %49 : vector<8x8xf32>
    %51 = math.exp %50 : vector<8x8xf32>
    %cst_16 = arith.constant dense<0.000000e+00> : vector<8xf32>
    %52 = vector.multi_reduction <add>, %51, %cst_16 [1] : vector<8x8xf32> to vector<8xf32>
    %53 = vector.shape_cast %52 : vector<8xf32> to vector<8x1xf32>
    %54 = math.log %53 : vector<8x1xf32>
    %55 = arith.addf %48, %54 : vector<8x1xf32>
    %56 = vector.extract_strided_slice %0 {offsets = [0, 2], sizes = [8, 1], strides = [1, 1]} : vector<8x3xi32> to vector<8x1xi32>
    %57 = tpu.iota {dimensions = array<i32: 1>} : vector<8x8xi32>
    %58 = vector.broadcast %56 : vector<8x1xi32> to vector<8x8xi32>
    %59 = arith.cmpi eq, %57, %58 : vector<8x8xi32>
    %cst_17 = arith.constant 0.000000e+00 : f32
    %60 = vector.broadcast %cst_17 : f32 to vector<8x8xf32>
    %61 = arith.select %59, %46, %60 : vector<8x8xi1>, vector<8x8xf32>
    %cst_18 = arith.constant dense<0.000000e+00> : vector<8xf32>
    %62 = vector.multi_reduction <add>, %61, %cst_18 [1] : vector<8x8xf32> to vector<8xf32>
    %63 = vector.shape_cast %62 : vector<8xf32> to vector<8x1xf32>
    %64 = arith.subf %55, %63 : vector<8x1xf32>
    %cst_19 = arith.constant 2.500000e-01 : f32
    %65 = vector.broadcast %cst_19 : f32 to vector<8x1xf32>
    %66 = arith.mulf %65, %64 : vector<8x1xf32>
    %67 = arith.addf %45, %66 : vector<8x1xf32>
    %c8_i32 = arith.constant 8 : i32
    %68 = arith.muli %arg0, %c8_i32 : i32
    %69 = tpu.iota {dimensions = array<i32: 0>} : vector<8x1xi32>
    %70 = vector.broadcast %68 : i32 to vector<8x1xi32>
    %71 = arith.addi %70, %69 : vector<8x1xi32>
    %c20_i32 = arith.constant 20 : i32
    %72 = vector.broadcast %c20_i32 : i32 to vector<8x1xi32>
    %73 = arith.cmpi slt, %71, %72 : vector<8x1xi32>
    %cst_20 = arith.constant 0.000000e+00 : f32
    %74 = vector.broadcast %cst_20 : f32 to vector<8x1xf32>
    %75 = arith.select %73, %67, %74 : vector<8x1xi1>, vector<8x1xf32>
    %76 = vector.shape_cast %75 : vector<8x1xf32> to vector<1x8x1xf32>
    %cst_21 = arith.constant dense<0.000000e+00> : vector<1xf32>
    %77 = vector.multi_reduction <add>, %76, %cst_21 [1, 2] : vector<1x8x1xf32> to vector<1xf32>
    %78 = vector.shape_cast %77 : vector<1xf32> to vector<1x1x1xf32>
    %79 = vector.extract %78[0, 0, 0] : f32 from vector<1x1x1xf32>
    %80 = tpu.iota {dimensions = array<i32: 1>} : vector<1x8x128xi32>
    %81 = tpu.iota {dimensions = array<i32: 2>} : vector<1x8x128xi32>
    %c0_i32 = arith.constant 0 : i32
    %82 = vector.broadcast %c0_i32 : i32 to vector<1x8x128xi32>
    %83 = arith.cmpi eq, %80, %82 : vector<1x8x128xi32>
    %c0_i32_22 = arith.constant 0 : i32
    %84 = vector.broadcast %c0_i32_22 : i32 to vector<1x8x128xi32>
    %85 = arith.cmpi eq, %81, %84 : vector<1x8x128xi32>
    %86 = arith.andi %83, %85 : vector<1x8x128xi1>
    %cst_23 = arith.constant 0.000000e+00 : f32
    %87 = vector.broadcast %79 : f32 to vector<1x8x128xf32>
    %88 = vector.broadcast %cst_23 : f32 to vector<1x8x128xf32>
    %89 = arith.select %86, %87, %88 : vector<1x8x128xi1>, vector<1x8x128xf32>
    %c0_24 = arith.constant 0 : index
    %c0_25 = arith.constant 0 : index
    %c0_26 = arith.constant 0 : index
    %90 = vector.load %arg3[%c0_24, %c0_25, %c0_26] : memref<1x8x128xf32, #tpu.memory_space<vmem>>, vector<1x8x128xf32>
    tpu.vector_store %arg3[%c0_24, %c0_25, %c0_26], %89 {strides = array<i32>} : memref<1x8x128xf32, #tpu.memory_space<vmem>>, vector<1x8x128xf32>,
    return
  }
  func.func @transform_0(%arg0: i32) -> (i32, i32) {
    %c0_i32 = arith.constant 0 : i32
    %c0_i32_0 = arith.constant 0 : i32
    return %arg0, %c0_i32 : i32, i32
  }
  func.func @transform_1(%arg0: i32) -> (i32, i32) {
    %c0_i32 = arith.constant 0 : i32
    %c0_i32_0 = arith.constant 0 : i32
    return %arg0, %c0_i32 : i32, i32
  }
  func.func @transform_2(%arg0: i32) -> (i32, i32, i32) {
    %c0_i32 = arith.constant 0 : i32
    %c0_i32_0 = arith.constant 0 : i32
    %c0_i32_1 = arith.constant 0 : i32
    return %arg0, %c0_i32, %c0_i32_0 : i32, i32, i32
  }
}

</mosaic_0001>

<bundles_post_ra>
// kernel: tpu_custom_call.1
= control target key start
LH: loop header
LB: loop body
LE: loop exit
PB: predicated region body
PF: predicated region fallthrough
CT: control target
= control target key end

     0   :  { %7 = vsyncpa [#allocation3], 0  ;;  %s622_s0 = inlined_call_operand.vmem [shape: f32[24,16], index: 0, kind: input, shape index: {}]   ;;  %s623_s1 = inlined_call_operand.vmem [shape: s32[24,3], index: 1, kind: input, shape index: {}]   ;;  %s624_s2 = inlined_call_operand.hbm [shape: f32[3,8,128], index: 2, kind: output, shape index: {}]  }
   0x1   :  { %9 = vsyncpa [#allocation3 + $0x1], 0  ;;  %s517_s9 = smov 0   ;;  %s519_s10 = smov 0  }
   0x2   :  { %s521_s11 = smov 0   ;;  %s523_s12 = smov 0  }
   0x3 LB: > { %s538_s13 = sadd.s32 4294967295, %s495_s12   ;;  %s359_s14 = sadd.s32 4294967294, %s495_s12   ;;  %s495_s12 = sphi %s523_s12, %s630_s12   ;;  %s491_s11 = sphi %s521_s11, %s629_s11   ;;  %s487_s10 = sphi %s519_s10, %s628_s10   ;;  %s483_s9 = sphi %s517_s9, %s627_s9  }
   0x4   : > { %s542_s15 = sadd.s32 1, %s495_s12   ;;  %s74_s16 = sadd.s32 1, %s491_s11 }
   0x5   : > { %s71_s17 = ssub.s32 %s495_s12, %s542_s15  ;;  %p84_p0 = scmp.ne.s32.totalorder %s491_s11, %s487_s10 }
   0x6   : > { %p72_p1 = scmp.eq.s32.totalorder %s71_s17, 0  ;;  %p85_p2 = scmp.eq.s32.totalorder %s538_s13, 2 }
   0x7   : > { %p90_p3 = scmp.ne.s32.totalorder %s487_s10, %s483_s9  ;;  %p91_p4 = scmp.eq.s32.totalorder %s359_s14, 2 }
   0x8   : > { %s553_s18 = scalar_select %p72_p1, %s491_s11, %s74_s16  }
   0x9   : > { %p555_p5 = por %p85_p2, %p84_p0  ;;  %p559_p6 = por %p91_p4, %p90_p3 }
   0xa   : > { %p362_p7 = scmp.ge.s32.totalorder %s495_s12, 1  ;;  %p123_p8 = scmp.lt.s32.totalorder %s495_s12, 4 }
   0xc   : > { %p124_p9 = pnand %p362_p7, %p123_p8 }
   0xd   : > { %p148_p10 = scmp.lt.s32.totalorder (!%p124_p9), %s538_s13, 2  ;;  %s499_s29 = smov (!%p124_p9), 125  }
   0xe   : > { %127 = sbr.rel (%p124_p9) target bundleno = 588 (0x24c), region = 28  ;;  %s501_s30 = smov (!%p124_p9), 120  }
   0xf   : > { %s366_s3 = sshll.u32 (!%p124_p9), %s538_s13, 3  ;;  %s145_s4 = sand.u32 (!%p124_p9), 1, %s487_s10  }
  0x10   : > { %s363_s5 = sshll.u32 (!%p124_p9), %s145_s4, 3  ;;  %s283_s8 = scalar_lea.hbm (!%p124_p9), %s624_s2, %s366_s3 }
  0x11   : > { %s147_s14 = scalar_lea.vmem (!%p124_p9), [#allocation2], %s363_s5  ;;  %s287_s17 = sshll.u32 (!%p124_p9), %s283_s8, 4  ;;  %s288_s17 = int_to_ptr.hbm [resolvable:$true] %s287_s17 }
  0x12   : > { %s285_s16 = sshll.u32 (!%p124_p9), %s147_s14, 4  ;;  %s453_s26 = scalar_lea.hbm (!%p124_p9), %s624_s2, 24  ;;  %s286_s16 = int_to_ptr.vmem [resolvable:$true] %s285_s16 }
  0x13   : > { %v497_v0 = vmov 1   ;;  %s149_s21 = scalar_select %p148_p10, %s538_s13, 2  ;;  %vm183_vm0 = vcmask 64536   ;;  %vm158_vm1 = vcmask 23552   ;;  %vm216_vm2 = vcmask 130112  }
  0x14   : > { %417 = vset.pattern.permute.xlu2 %v497_v0  ;;  %v498_v6 = vmov 0   ;;  %v500_v7 = vmov 2   ;;  %v171_v15 = vlaneseq  ;;  %vm227_vm4 = vcmask 64512   ;;  %s447_s13 = sshra.s32 %s288_s17, 4  ;;  %s448_s13 = int_to_ptr.hbm [resolvable:$true] %s447_s13 }
  0x15   : > { %s364_s22 = sshll.u32 %s149_s21, 3  ;;  %420 = vset.pattern.permute.xlu0 %v500_v7  ;;  %vm194_vm6 = vcmask 39936   ;;  %v251_v52 = vstv %s366_s3  ;;  %vm255_vm9 = vcmask 7168   ;;  %s449_s23 = scalar_lea.hbm %s448_s13, 8 }
  0x16   : > { %s151_s25 = scalar_lea.vmem %s622_s0, %s364_s22  ;;  %s155_s28 = scalar_lea.vmem %s623_s1, %s364_s22  ;;  %v577_v18 = vand.u32 127, %v171_v15  ;;  %v250_v48 = vshrl.u32 %v171_v15, 7 }
  0x17   : > { %v157_v1 = vld [vmem:[%s151_s25] sm:$0xff]  ;;  %s273_s22 = scalar_lea.sflag [#allocation3], %s145_s4  ;;  %p450_p11 = scmp.ne.s32.totalorder %s448_s13, %s449_s23 }
  0x18   : > { %v156_v2 = vld [vmem:[%s155_s28] sm:$0xff]  ;;  %v184_v3 = vsel %vm183_vm0, %v157_v1, -inf  ;;  %v159_v4 = vsel %vm158_vm1, %v157_v1, -inf  ;;  %v217_v5 = vsel %vm216_vm2, %v157_v1, -inf  ;;  %v252_v57 = vadd.s32 %v251_v52, %v250_v48  ;;  %p454_p0 = scmp.lt.s32.totalorder %s448_s13, %s624_s2  ;;  %p455_p1 = scmp.lt.s32.totalorder %s453_s26, %s449_s23 }
  0x19   : > { %202 = vperm.xlu2 %417, %v156_v2   ;;  %185 = vmax.xlane.f32.xlu0 %v184_v3  ;;  %vm266_vm10 = vcmp.eq.s32.totalorder %v250_v48, 0  ;;  %vm267_vm11 = vcmp.eq.s32.totalorder %v577_v18, 0  ;;  %p451_p12 = pnand %p450_p11, %p555_p5 }
  0x1a   : > { %160 = vmax.xlane.f32.xlu1 %v159_v4  ;;  %vm253_vm8 = vcmp.lt.s32.totalorder %v252_v57, 20  ;;  %vm268_vm12 = vmand %vm266_vm10, %vm267_vm11  ;;  %p456_p2 = por %p455_p1, %p454_p0 }
  0x1b   : > { %p452_p13 = pneg %p451_p12 }
  0x1d   : > { %p457_p3 = pnand %p456_p2, %p452_p13 }
  0x21   : > { %418 = vset.pattern.permute.xlu2 %v498_v6  ;;  %218 = vmax.xlane.f32.xlu0 %v217_v5 }
  0x22   : > { %174 = vperm.xlu2 %418, %v156_v2  }
  0x2a   : > { %419 = vset.pattern.permute.xlu2 %v500_v7 }
  0x35   : > { %206 = vrot.lane.b32.xlu0 %v157_v1, %s499_s29 }
  0x73   : > { %v203_v8 = vpop.permute.xlu2 %202 }
  0x74   : > { %vm204_vm7 = vcmp.eq.s32.totalorder %v577_v18, %v203_v8 }
  0x7c   : > { %v175_v19 = vpop.permute.xlu2 %174 }
  0x7d   : > { %vm176_vm3 = vcmp.eq.s32.totalorder %v577_v18, %v175_v19 }
  0x7e   : > { %v177_v24 = vsel %vm176_vm3, %v157_v1, 0.0 }
  0x7f   : > { %v178_v26 = vsel %vm158_vm1, %v177_v24, 0.0 }
  0x8c   : > { %v574_v9 = vpop.xlane.xlu0 %185 }
  0x8d   : > { %v161_v10 = vpop.xlane.xlu1 %160  ;;  %v187_v11 = vsub.f32 %v157_v1, %v574_v9 }
  0x8e   : > { %v162_v12 = vsub.f32 %v157_v1, %v161_v10 }
  0x8f   : > { %v188_v13 = vmul.f32 1.442695, %v187_v11 }
  0x90   : > { %v163_v14 = vmul.f32 1.442695, %v162_v12 }
  0x91   : > { %421 = vpow2.f32 %v188_v13 }
  0x92   : > { %423 = vpow2.f32 %v163_v14 }
  0x94   : > { %v219_v16 = vpop.xlane.xlu0 %218 }
  0x95   : > { %v220_v17 = vsub.f32 %v157_v1, %v219_v16 }
  0x97   : > { %v422_v20 = vpop.eup %421  ;;  %v221_v21 = vmul.f32 1.442695, %v220_v17 }
  0x98   : > { %v424_v22 = vpop.eup %423  ;;  %191 = vrot.lane.b32.xlu1 %v422_v20, %s499_s29 }
  0x99   : > { %425 = vpow2.f32 %v221_v21  ;;  %v165_v23 = vsel %vm158_vm1, %v424_v22, 0.0 }
  0x9a   : > { %166 = vadd.xlane.f32.xlu0 %v165_v23 }
  0x9f   : > { %v426_v25 = vpop.eup %425 }
  0xa0   : > { %224 = vrot.lane.b32.xlu2 %v426_v25, %s501_s30 }
  0xa2   : > { %179 = vadd.xlane.f32.xlu0 %v178_v26 }
  0xa7   : > { %v207_v35 = vpop.permute.xlu0 %206 }
  0xa8   : > { %235 = vperm.xlu2 %419, %v156_v2   ;;  %v209_v36 = vsel %vm204_vm7, %v207_v35, 0.0 }
  0xa9   : > { %v210_v37 = vsel %vm194_vm6, %v209_v36, 0.0 }
  0xb0   : > { %238 = vrot.lane.b32.xlu2 %v157_v1, %s501_s30 }
  0xfa   : > { %v225_v27 = vpop.permute.xlu2 %224 }
  0xfb   : > { %v228_v28 = vsel %vm227_vm4, %v225_v27, 0.0 }
  0xfc   : > { %229 = vadd.xlane.f32.xlu2 %v228_v28 }
 0x102   : > { %v236_v29 = vpop.permute.xlu2 %235 }
 0x103   : > { %vm237_vm5 = vcmp.eq.s32.totalorder %v577_v18, %v236_v29 }
 0x10a   : > { %v239_v30 = vpop.permute.xlu2 %238  ;;  %v192_v31 = vpop.permute.xlu1 %191 }
 0x10b   : > { %v241_v32 = vsel %vm237_vm5, %v239_v30, 0.0  ;;  %v195_v33 = vsel %vm194_vm6, %v192_v31, 0.0 }
 0x10c   : > { %196 = vadd.xlane.f32.xlu1 %v195_v33  ;;  %v242_v34 = vsel %vm227_vm4, %v241_v32, 0.0 }
 0x10d   : > { %243 = vadd.xlane.f32.xlu2 %v242_v34  ;;  %v167_v38 = vpop.xlane.xlu0 %166 }
 0x10e   : > { %427 = vlog2.f32 %v167_v38 }
 0x114   : > { %211 = vadd.xlane.f32.xlu1 %v210_v37  ;;  %v428_v41 = vpop.eup %427 }
 0x115   : > { %v169_v43 = vmul.f32 0.6931472, %v428_v41  ;;  %v180_v53 = vpop.xlane.xlu0 %179 }
 0x117   : > { %v170_v49 = vadd.f32 %v169_v43, %v161_v10 }
 0x119   : > { %v181_v58 = vsub.f32 %v170_v49, %v180_v53 }
 0x16f   : > { %v230_v39 = vpop.xlane.xlu2 %229 }
 0x170   : > { %429 = vlog2.f32 %v230_v39 }
 0x176   : > { %v430_v42 = vpop.eup %429 }
 0x177   : > { %v232_v44 = vmul.f32 0.6931472, %v430_v42 }
 0x179   : > { %v233_v50 = vadd.f32 %v232_v44, %v219_v16 }
 0x17f   : > { %v197_v40 = vpop.xlane.xlu1 %196 }
 0x180   : > { %431 = vlog2.f32 %v197_v40  ;;  %v244_v47 = vpop.xlane.xlu2 %243 }
 0x181   : > { %v245_v55 = vsub.f32 %v233_v50, %v244_v47 }
 0x183   : > { %v246_v60 = vmul.f32 0.25, %v245_v55 }
 0x186   : > { %v432_v45 = vpop.eup %431 }
 0x187   : > { %v199_v46 = vmul.f32 0.6931472, %v432_v45  ;;  %v212_v54 = vpop.xlane.xlu1 %211 }
 0x189   : > { %v200_v51 = vadd.f32 %v199_v46, %v574_v9 }
 0x18b   : > { %v213_v56 = vsub.f32 %v200_v51, %v212_v54 }
 0x18d   : > { %v214_v59 = vmul.f32 0.5, %v213_v56 }
 0x18f   : > { %v215_v61 = vadd.f32 %v214_v59, %v181_v58 }
 0x191   : > { %v247_v62 = vadd.f32 %v246_v60, %v215_v61 }
 0x193   : > { %v254_v63 = vsel %vm253_vm8, %v247_v62, 0.0 }
 0x194   : > { %v256_v0 = vsel %vm255_vm9, %v254_v63, 0.0 }
 0x195   : > { %257 = vadd.xlane.f32.xlu1 %v256_v0 }
 0x208   : > { %v258_v1 = vpop.xlane.xlu1 %257 }
 0x209   : > { %v259_v2 = vrot.slane %v258_v1, 4 }
 0x20b   : > { %v260_v3 = vadd.f32 %v259_v2, %v258_v1 }
 0x20d   : > { %v261_v4 = vrot.slane %v260_v3, 2 }
 0x20f   : > { %v262_v5 = vadd.f32 %v261_v4, %v260_v3 }
 0x211   : > { %v263_v6 = vrot.slane %v262_v5, 1 }
 0x213   : > { %v264_v7 = vadd.f32 %v263_v6, %v262_v5 }
 0x215   : > { %371 = vpush %v264_v7 }
 0x246   : > { %s372_s21 = spop %371 }
 0x247   : > { %v269_v8 = vstv %s372_s21 }
 0x248   : > { %v270_v9 = vsel %vm268_vm12, %v269_v8, 0.0 }
 0x249   : > { %271 = vst [vmem:[%s147_s14] sm:$0xff] %v270_v9 }
 0x24a   : > { %460 = shalt.err (!%p457_p3)
}
 0x24b   : > { %373 = dma.vmem_to_hbm [thread:$0]  (%p555_p5), %s286_s16, 128, %s288_s17, %s273_s22  }
 0x24c PF: > { %p379_p4 = scmp.ge.s32.totalorder %s495_s12, 2  ;;  %s299_s29 = sand.u32 1, %s483_s9  }
 0x24d   : > { %s300_s30 = scalar_lea.sflag [#allocation3], %s299_s29 }
 0x24e   : > { %p376_p7 = pnand %p379_p4, %p559_p6 }
 0x250   : > { %p377_p8 = pneg %p376_p7 }
 0x252   : > { %478 = dma.done.wait (%p377_p8), %s300_s30, 128  }
 0x253   : > { %480 = vsyncadd (%p377_p8), %s300_s30, 4294967168  ;;  %p12_p9 = scmp.ge.s32.totalorder %s542_s15, 5   ;;  %s627_s9 = smov %s487_s10 }
 0x254   : > { %s628_s10 = smov %s491_s11  ;;  %s629_s11 = smov %s553_s18 }
 0x255   : > { %s630_s12 = smov %s542_s15  ;;  %14 = sbr.rel (!%p12_p9) target bundleno = 3 (0x3), region = 66 }
 0x25a   :  { %306 = vsyncpa [#allocation3], 1 }
 0x25b   :  { %308 = vsyncpa [#allocation3 + $0x1], 1 }

</bundles_post_ra>
